<compile_context>
chip_gen: v5e
topology: v5e:2x2
jax: 0.10.0
libtpu: 0.0.40
codegen_flags: <defaults>
</compile_context>

<pallas_src>
import math

import jax
import jax.numpy as jnp
from jax import lax
from jax.experimental import pallas as pl
from jax.experimental.pallas import tpu as pltpu


def _sdpa_kernel(q_ref, k_ref, v_ref, opt_ref, attn_ref):
    # Block shapes: q (1, tm, H) [pre-scaled by 1/sqrt(H)], k/v (1, M, H).
    q = q_ref[0]                                      # (tm, H)
    k = k_ref[0]                                      # (M, H)
    v = v_ref[0]                                      # (M, H)

    # Scaled scores (tm, M): contract the last dims so the MXU consumes K
    # transposed directly (no materialized k.T).
    s = lax.dot_general(q, k, (((1,), (1,)), ((), ())),
                        preferred_element_type=jnp.float32)

    # Numerically-stable softmax along the last axis (nn.Softmax(dim=-1)).
    s_max = jnp.max(s, axis=-1, keepdims=True)
    p = jnp.exp(s - s_max)
    denom = jnp.sum(p, axis=-1, keepdims=True)        # (tm, 1)
    attn = p * (1.0 / denom)                          # tm reciprocals + VPU mul

    # Attention-weighted values: (tm, H)
    opt = jnp.dot(attn, v, preferred_element_type=jnp.float32)

    attn_ref[0] = attn.astype(attn_ref.dtype)
    opt_ref[0] = opt.astype(opt_ref.dtype)


def _vmem_capacity_bytes():
    """Per-core VMEM capacity; conservative fallback if the query fails."""
    try:
        info = pltpu.get_tpu_info()
        cap = getattr(info, "vmem_capacity_bytes", None)
        if cap:
            return int(cap)
    except Exception:
        pass
    return 64 * 1024 * 1024   # v7x-sized conservative default


def _vmem_need_bytes(tm, M, H):
    """Estimated resident VMEM for one grid step (f32, double-buffered I/O)."""
    itm = 4
    q_in = 2 * tm * H * itm            # query block (double-buffered)
    kv_in = 2 * 2 * M * H * itm        # k and v blocks (double-buffered)
    opt_out = 2 * tm * H * itm
    attn_out = 2 * tm * M * itm
    temps = 3 * tm * M * itm           # s, p, attn temporaries
    return q_in + kv_in + opt_out + attn_out + temps


def _pick_q_tile(M, H, vmem_budget):
    """Largest query tile dividing M whose working set fits the VMEM budget."""
    if M <= 128:
        return M
    cands = [t for t in (512, 256, 128, 64, 32, 16, 8) if M % t == 0]
    if not cands:
        # TODO(synk): pad M (and mask) instead of a full-M-resident score tile
        # when M is large and has no small divisor.
        return M
    for t in cands:
        if _vmem_need_bytes(t, M, H) <= vmem_budget:
            return t
    return cands[-1]


def sdpa_forward(x, w_qkv, b_qkv):
    """x: (B, M, H) float32. w_qkv: (H, 3H). b_qkv: (3H,). Returns (opt, attn)."""
    B, M, H = x.shape
    inv_scale = 1.0 / math.sqrt(H)

    # Fused QKV projection ONCE per token (plain XLA matmul on the MXU) with
    # the attention scale folded into Q; equivalent to .chunk(3, dim=-1) plus
    # prod / sqrt(H) in the reference. Doing this here (instead of per query
    # tile in-kernel) removes the nqt-fold re-projection of K/V.
    qkv = jnp.einsum("bmh,hk->bmk", x.astype(jnp.float32),
                     w_qkv.astype(jnp.float32)) + b_qkv.astype(jnp.float32)
    q = qkv[..., :H] * inv_scale
    k = qkv[..., H:2 * H]
    v = qkv[..., 2 * H:]

    # VMEM-aware query tiling + explicit scoped-VMEM limit (v5e default is
    # only 16 MiB; v7x physical is 64 MiB; v5e/v6e physical is 128 MiB).
    vmem_cap = _vmem_capacity_bytes()
    budget = int(vmem_cap * 0.75)          # headroom for compiler scratch
    tm = _pick_q_tile(M, H, budget)
    assert M % tm == 0
    nqt = M // tm
    vmem_limit = min(budget,
                     max(2 * _vmem_need_bytes(tm, M, H), 32 * 1024 * 1024))

    cost = pl.CostEstimate(
        flops=4 * B * M * M * H,                       # QK^T + attn@V
        transcendentals=B * M * M,                     # exp over score tiles
        bytes_accessed=4 * (3 * B * M * H              # q, k, v reads
                            + B * M * H                # opt write
                            + B * M * M),              # attn write
    )

    grid_spec = pltpu.PrefetchScalarGridSpec(
        num_scalar_prefetch=0,
        grid=(B, nqt),
        in_specs=[
            pl.BlockSpec((1, tm, H), lambda b, qi: (b, qi, 0)),   # q (scaled)
            pl.BlockSpec((1, M, H), lambda b, qi: (b, 0, 0)),     # k (const over qi)
            pl.BlockSpec((1, M, H), lambda b, qi: (b, 0, 0)),     # v (const over qi)
        ],
        out_specs=[
            pl.BlockSpec((1, tm, H), lambda b, qi: (b, qi, 0)),   # opt
            pl.BlockSpec((1, tm, M), lambda b, qi: (b, qi, 0)),   # attn
        ],
    )

    opt, attn = pl.pallas_call(
        _sdpa_kernel,
        grid_spec=grid_spec,
        out_shape=(
            jax.ShapeDtypeStruct((B, M, H), x.dtype),
            jax.ShapeDtypeStruct((B, M, M), x.dtype),
        ),
        compiler_params=pltpu.CompilerParams(
            dimension_semantics=("parallel", "parallel"),
            vmem_limit_bytes=vmem_limit),
        cost_estimate=cost,
    )(q, k, v)
    return opt, attn


def sdpa_reference(x, w_qkv, b_qkv):
    """Pure-JAX reference mirroring the PyTorch forward."""
    H = x.shape[-1]
    qkv = jnp.einsum("bmh,hk->bmk", x, w_qkv) + b_qkv
    q, k, v = qkv[..., :H], qkv[..., H:2 * H], qkv[..., 2 * H:]
    prod = jnp.einsum("bmh,bnh->bmn", q, k)
    attn = jax.nn.softmax(prod / math.sqrt(H), axis=-1)
    opt = jnp.einsum("bmn,bnh->bmh", attn, v)
    return opt, attn


if __name__ == "__main__":
    B, M, H = 2, 8, 32  # batch (bp), seq (m), hidden_dim (h)

    key = jax.random.PRNGKey(0)
    kx, kw, kb = jax.random.split(key, 3)

    x = jax.random.normal(kx, (B, M, H), dtype=jnp.float32)
    # Deterministic synthetic parameters for nn.Linear(hidden, 3*hidden).
    w_qkv = jax.random.normal(kw, (H, 3 * H), dtype=jnp.float32) / math.sqrt(H)
    b_qkv = jax.random.normal(kb, (3 * H,), dtype=jnp.float32) * 0.01

    opt, attn = sdpa_forward(x, w_qkv, b_qkv)
    jax.block_until_ready((opt, attn))

    opt_ref, attn_ref = sdpa_reference(x, w_qkv, b_qkv)
    assert jnp.allclose(opt, opt_ref, atol=1e-4, rtol=1e-4)
    assert jnp.allclose(attn, attn_ref, atol=1e-4, rtol=1e-4)

    print("KERNEL_OK")
</pallas_src>

<mosaic_0001>
module attributes {stable_mosaic.version = 11 : i64} {
  func.func @_sdpa_kernel(%arg0: i32, %arg1: i32, %arg2: memref<1x8x32xf32, #tpu.memory_space<vmem>>, %arg3: memref<1x8x32xf32, #tpu.memory_space<vmem>>, %arg4: memref<1x8x32xf32, #tpu.memory_space<vmem>>, %arg5: memref<1x8x32xf32, #tpu.memory_space<vmem>>, %arg6: memref<1x8x8xf32, #tpu.memory_space<vmem>>) attributes {dimension_semantics = [#tpu.dimension_semantics<parallel>, #tpu.dimension_semantics<parallel>], iteration_bounds = array<i64: 2, 1>, scalar_prefetch = 0 : i64, scratch_operands = 0 : i64, tpu.core_type = #tpu.core_type<tc>, window_params = [{transform_indices = @transform_0, window_bounds = array<i64: 1, 8, 32>}, {transform_indices = @transform_1, window_bounds = array<i64: 1, 8, 32>}, {transform_indices = @transform_2, window_bounds = array<i64: 1, 8, 32>}, {transform_indices = @transform_3, window_bounds = array<i64: 1, 8, 32>}, {transform_indices = @transform_4, window_bounds = array<i64: 1, 8, 8>}]} {
    %c0 = arith.constant 0 : index
    %c0_0 = arith.constant 0 : index
    %c0_1 = arith.constant 0 : index
    %0 = vector.load %arg2[%c0, %c0_0, %c0_1] : memref<1x8x32xf32, #tpu.memory_space<vmem>>, vector<1x8x32xf32>
    %1 = vector.shape_cast %0 : vector<1x8x32xf32> to vector<8x32xf32>
    %c0_2 = arith.constant 0 : index
    %c0_3 = arith.constant 0 : index
    %c0_4 = arith.constant 0 : index
    %2 = vector.load %arg3[%c0_2, %c0_3, %c0_4] : memref<1x8x32xf32, #tpu.memory_space<vmem>>, vector<1x8x32xf32>
    %3 = vector.shape_cast %2 : vector<1x8x32xf32> to vector<8x32xf32>
    %c0_5 = arith.constant 0 : index
    %c0_6 = arith.constant 0 : index
    %c0_7 = arith.constant 0 : index
    %4 = vector.load %arg4[%c0_5, %c0_6, %c0_7] : memref<1x8x32xf32, #tpu.memory_space<vmem>>, vector<1x8x32xf32>
    %5 = vector.shape_cast %4 : vector<1x8x32xf32> to vector<8x32xf32>
    %cst = arith.constant dense<0.000000e+00> : vector<8x8xf32>
    %6 = tpu.matmul %1, %3, %cst {dimension_numbers = #tpu.dot_dimension_numbers<[1], [1], [0], [0], [0, 0, 1, 0], [], []>} : vector<8x32xf32>, vector<8x32xf32>, vector<8x8xf32> -> vector<8x8xf32>
    %cst_8 = arith.constant dense<0xFF800000> : vector<8xf32>
    %7 = vector.multi_reduction <maximumf>, %6, %cst_8 [1] : vector<8x8xf32> to vector<8xf32>
    %8 = vector.shape_cast %7 : vector<8xf32> to vector<8x1xf32>
    %9 = vector.broadcast %8 : vector<8x1xf32> to vector<8x8xf32>
    %10 = arith.subf %6, %9 : vector<8x8xf32>
    %11 = math.exp %10 : vector<8x8xf32>
    %cst_9 = arith.constant dense<0.000000e+00> : vector<8xf32>
    %12 = vector.multi_reduction <add>, %11, %cst_9 [1] : vector<8x8xf32> to vector<8xf32>
    %13 = vector.shape_cast %12 : vector<8xf32> to vector<8x1xf32>
    %cst_10 = arith.constant 1.000000e+00 : f32
    %14 = vector.broadcast %cst_10 : f32 to vector<8x1xf32>
    %15 = arith.divf %14, %13 : vector<8x1xf32>
    %16 = vector.broadcast %15 : vector<8x1xf32> to vector<8x8xf32>
    %17 = arith.mulf %11, %16 : vector<8x8xf32>
    %cst_11 = arith.constant dense<0.000000e+00> : vector<8x32xf32>
    %18 = tpu.matmul %17, %5, %cst_11 {dimension_numbers = #tpu.dot_dimension_numbers<[1], [0], [0], [1], [0, 0, 1, 1], [], []>} : vector<8x8xf32>, vector<8x32xf32>, vector<8x32xf32> -> vector<8x32xf32>
    %c0_12 = arith.constant 0 : index
    %c0_13 = arith.constant 0 : index
    %c0_14 = arith.constant 0 : index
    %19 = vector.load %arg6[%c0_12, %c0_13, %c0_14] : memref<1x8x8xf32, #tpu.memory_space<vmem>>, vector<1x8x8xf32>
    %20 = vector.shape_cast %19 : vector<1x8x8xf32> to vector<8x8xf32>
    %21 = vector.shape_cast %17 : vector<8x8xf32> to vector<1x8x8xf32>
    tpu.vector_store %arg6[%c0_12, %c0_13, %c0_14], %21 {strides = array<i32>} : memref<1x8x8xf32, #tpu.memory_space<vmem>>, vector<1x8x8xf32>,
    %c0_15 = arith.constant 0 : index
    %c0_16 = arith.constant 0 : index
    %c0_17 = arith.constant 0 : index
    %22 = vector.load %arg5[%c0_15, %c0_16, %c0_17] : memref<1x8x32xf32, #tpu.memory_space<vmem>>, vector<1x8x32xf32>
    %23 = vector.shape_cast %22 : vector<1x8x32xf32> to vector<8x32xf32>
    %24 = vector.shape_cast %18 : vector<8x32xf32> to vector<1x8x32xf32>
    tpu.vector_store %arg5[%c0_15, %c0_16, %c0_17], %24 {strides = array<i32>} : memref<1x8x32xf32, #tpu.memory_space<vmem>>, vector<1x8x32xf32>,
    return
  }
  func.func @transform_0(%arg0: i32, %arg1: i32) -> (i32, i32, i32) {
    %c0_i32 = arith.constant 0 : i32
    %c0_i32_0 = arith.constant 0 : i32
    return %arg0, %arg1, %c0_i32 : i32, i32, i32
  }
  func.func @transform_1(%arg0: i32, %arg1: i32) -> (i32, i32, i32) {
    %c0_i32 = arith.constant 0 : i32
    %c0_i32_0 = arith.constant 0 : i32
    %c0_i32_1 = arith.constant 0 : i32
    return %arg0, %c0_i32, %c0_i32_0 : i32, i32, i32
  }
  func.func @transform_2(%arg0: i32, %arg1: i32) -> (i32, i32, i32) {
    %c0_i32 = arith.constant 0 : i32
    %c0_i32_0 = arith.constant 0 : i32
    %c0_i32_1 = arith.constant 0 : i32
    return %arg0, %c0_i32, %c0_i32_0 : i32, i32, i32
  }
  func.func @transform_3(%arg0: i32, %arg1: i32) -> (i32, i32, i32) {
    %c0_i32 = arith.constant 0 : i32
    %c0_i32_0 = arith.constant 0 : i32
    return %arg0, %arg1, %c0_i32 : i32, i32, i32
  }
  func.func @transform_4(%arg0: i32, %arg1: i32) -> (i32, i32, i32) {
    %c0_i32 = arith.constant 0 : i32
    %c0_i32_0 = arith.constant 0 : i32
    return %arg0, %arg1, %c0_i32 : i32, i32, i32
  }
}

</mosaic_0001>

<bundles_post_ra>
// kernel: tpu_custom_call.1
= control target key start
LH: loop header
LB: loop body
LE: loop exit
PB: predicated region body
PF: predicated region fallthrough
CT: control target
= control target key end

     0   :  { %s1116_s0 = inlined_call_operand.hbm [shape: f32[2,8,32], index: 0, kind: input, shape index: {}]   ;;  %s1117_s1 = inlined_call_operand.hbm [shape: f32[2,8,32], index: 1, kind: input, shape index: {}]   ;;  %s1118_s2 = inlined_call_operand.hbm [shape: f32[2,8,32], index: 2, kind: input, shape index: {}]   ;;  %s1119_s3 = inlined_call_operand.hbm [shape: f32[2,8,32], index: 3, kind: output, shape index: {0}]   ;;  %s1120_s4 = inlined_call_operand.hbm [shape: f32[2,8,8], index: 4, kind: output, shape index: {1}]  }
   0x1   :  { %1124 = sst [smem:[#allocation19_spill]] %s1117_s1 }
   0x2   :  { %10 = vsyncpa [#allocation3], 0 }
   0x3   :  { %12 = vsyncpa [#allocation3 + $0x1], 0 }
   0x4   :  { %13 = vsyncpa [#allocation6], 0 }
   0x5   :  { %15 = vsyncpa [#allocation6 + $0x1], 0 }
   0x6   :  { %16 = vsyncpa [#allocation4], 0 }
   0x7   :  { %18 = vsyncpa [#allocation4 + $0x1], 0 }
   0x8   :  { %19 = vsyncpa [#allocation10], 0 }
   0x9   :  { %21 = vsyncpa [#allocation10 + $0x1], 0  ;;  %s936_s15 = smov 0   ;;  %s938_s16 = smov 0  }
   0xa   :  { %s940_s17 = smov 0   ;;  %s942_s18 = smov 0  }
   0xb   :  { %s944_s19 = smov 0   ;;  %s946_s20 = smov 0  }
   0xc LB: > { %1125 = sst [smem:[#allocation15_spill]] %s897_s17  ;;  %s967_s21 = sadd.s32 4294967295, %s909_s20   ;;  %s909_s20 = sphi %s946_s20, %s27_s20   ;;  %s905_s19 = sphi %s944_s19, %s1139_s19   ;;  %s901_s18 = sphi %s942_s18, %s1138_s18   ;;  %s897_s17 = sphi %s940_s17, %s1137_s17   ;;  %s893_s16 = sphi %s938_s16, %s1141_s16   ;;  %s889_s15 = sphi %s936_s15, %s1140_s15  }
   0xd   : > { %1126 = sst [smem:[#allocation16_spill]] %s905_s19  ;;  %s596_s22 = sadd.s32 4294967294, %s909_s20  }
   0xe   : > { %s39_s23 = sadd.s32 1, %s905_s19  ;;  %s48_s24 = sadd.s32 1, %s897_s17 }
   0xf   : > { %p41_p0 = scmp.ge.s32.totalorder %s39_s23, 2  ;;  %p55_p1 = scmp.ne.s32.totalorder %s897_s17, %s893_s16 }
  0x10   : > { %p56_p2 = scmp.eq.s32.totalorder %s909_s20, 0  ;;  %p61_p3 = scmp.ne.s32.totalorder %s893_s16, %s889_s15 }
  0x11   : > { %s1143_s23 = smov (%p41_p0, %s39_s23), 0  ;;  %p62_p5 = scmp.eq.s32.totalorder %s967_s21, 0 }
  0x12   : > { %1127 = sst [smem:[#allocation17_spill]] %s1143_s23  ;;  %p979_p4 = por %p56_p2, %p55_p1 }
  0x13   : > { %s43_s26 = ssub.s32 %s905_s19, %s1143_s23  ;;  %p139_p6 = scmp.eq.s32.totalorder %s967_s21, 1 }
  0x14   : > { %p46_p7 = scmp.eq.s32.totalorder %s43_s26, 0  ;;  %p987_p8 = por %p62_p5, %p61_p3 }
  0x15   : > { %p991_p9 = por %p139_p6, %p55_p1  ;;  %p145_p10 = scmp.eq.s32.totalorder %s596_s22, 1 }
  0x16   : > { %s996_s29 = scalar_select %p46_p7, %s897_s17, %s48_s24  }
  0x17   : > { %p998_p11 = por %p145_p10, %p61_p3  ;;  %p598_p12 = scmp.ge.s32.totalorder %s909_s20, 2 }
  0x18   : > { %1131 = sst [smem:[#allocation18_spill]] %s996_s29  ;;  %p647_p13 = scmp.lt.s32.totalorder %s909_s20, 2 }
  0x19   : > { %s193_s5 = sand.u32 1, %s897_s17   ;;  %s600_s7 = sshll.u32 %s905_s19, 3 }
  0x1a   : > { %s599_s6 = sshll.u32 %s193_s5, 3  ;;  %p1008_p0 = pnand %p647_p13, %p979_p4 }
  0x1b   : > { %s213_s9 = sand.u32 1, %s909_s20   ;;  %s1134_s1 = sld [smem:[#allocation19_spill]] }
  0x1c   : > { %s217_s14 = scalar_lea.vmem [#allocation5], %s599_s6  ;;  %s214_s24 = scalar_lea.sflag [#allocation6], %s213_s9 }
  0x1d   : > { %s225_s22 = sshll.u32 %s217_s14, 4  ;;  %p605_p1 = scmp.ge.s32.totalorder %s909_s20, 1  ;;  %s226_s22 = int_to_ptr.vmem [resolvable:$true] %s225_s22 }
  0x1e   : > { %p249_p2 = scmp.lt.s32.totalorder %s909_s20, 3  ;;  %s202_s10 = scalar_lea.hbm %s1116_s0, %s600_s7 }
  0x1f   : > { %s204_s11 = sshll.u32 %s202_s10, 4  ;;  %s194_s14 = scalar_lea.sflag [#allocation3], %s193_s5  ;;  %s205_s11 = int_to_ptr.hbm [resolvable:$true] %s204_s11 }
  0x20   : > { %p1020_p3 = pnand %p605_p1, %p249_p2  ;;  %s236_s29 = scalar_lea.vmem [#allocation7], %s599_s6 }
  0x21   : > { %s221_s12 = scalar_lea.hbm %s1134_s1, %s600_s7  ;;  %s244_s17 = sshll.u32 %s236_s29, 4  ;;  %s245_s17 = int_to_ptr.vmem [resolvable:$true] %s244_s17 }
  0x22   : > { %s223_s13 = sshll.u32 %s221_s12, 4  ;;  %s197_s12 = scalar_lea.vmem [#allocation2], %s599_s6  ;;  %s224_s13 = int_to_ptr.hbm [resolvable:$true] %s223_s13 }
  0x23   : > { %636 = dma.hbm_to_vmem [thread:$0]  (!%p1008_p0), %s224_s13, 128, %s226_s22, %s214_s24  }
  0x24   : > { %s206_s1 = sshll.u32 %s197_s12, 4  ;;  %s240_s22 = scalar_lea.hbm %s1118_s2, %s600_s7  ;;  %s207_s1 = int_to_ptr.vmem [resolvable:$true] %s206_s1 }
  0x25   : > { %633 = dma.hbm_to_vmem [thread:$0]  (!%p1008_p0), %s205_s11, 128, %s207_s1, %s194_s14  }
  0x26   : > { %s242_s19 = sshll.u32 %s240_s22, 4  ;;  %253 = sbr.rel (%p1020_p3) target bundleno = 570 (0x23a), region = 32  ;;  %s243_s19 = int_to_ptr.hbm [resolvable:$true] %s242_s19 }
  0x27   : > { %639 = dma.hbm_to_vmem [thread:$0]  (!%p1008_p0), %s243_s19, 128, %s245_s17, %s214_s24  }
  0x28   : > { %s1037_s23 = sand.u32 (!%p1020_p3), 1, %s893_s16  }
  0x29   : > { %s1040_s1 = sshll.u32 (!%p1020_p3), %s1037_s23, 3  ;;  %s256_s5 = scalar_lea.sflag (!%p1020_p3), [#allocation3], %s1037_s23 }
  0x2a   : > { %s259_s7 = scalar_lea.vmem (!%p1020_p3), [#allocation2], %s1040_s1 }
  0x2b   : > { %872 = dma.done.wait (%p987_p8), %s256_s5, 128  }
  0x2c   : > { %874 = vsyncadd (%p987_p8), %s256_s5, 4294967168  ;;  %s265_s17 = sand.u32 1, %s967_s21   ;;  %s269_s29 = scalar_lea.vmem [#allocation5], %s1040_s1 }
  0x2d   : > { %s266_s19 = scalar_lea.sflag [#allocation6], %s265_s17 }
  0x2e   : > { %876 = dma.done.wait (%p987_p8), %s266_s19, 256  }
  0x2f   : > { %878 = vsyncadd (%p987_p8), %s266_s19, 4294967040  ;;  %vm323_vm0 = vcmask 261120   ;;  %v321_v0 = vld [vmem:[%s269_s29] sm:$0xff]  ;;  %v320_v1 = vld [vmem:[%s259_s7] sm:$0xff]  ;;  %vm350_vm1 = vcmask 64512   ;;  %s279_s21 = scalar_lea.vmem [#allocation7], %s1040_s1 }
  0x30   : > { %611 = vmatpush.xpose.msk.msra.mxu0 %vm323_vm0, %v321_v0  ;;  %v322_v9 = vld [vmem:[%s279_s21] sm:$0xff]  ;;  %s616_s27 = sshll.u32 %s901_s18, 3  ;;  %s319_s25 = scalar_lea.vmem [#allocation9], %s1040_s1 }
  0x31   : > { %394 = vmatpush.msra.mxu1 %v322_v9  ;;  %s433_s24 = scalar_lea.hbm %s1120_s4, %s616_s27  ;;  %s435_s26 = sshll.u32 %s319_s25, 4  ;;  %s436_s26 = int_to_ptr.vmem [resolvable:$true] %s435_s26 }
  0x32   : > { %s437_s10 = sshll.u32 %s433_s24, 4  ;;  %s407_s11 = scalar_lea.sflag [#allocation10], %s1037_s23  ;;  %s438_s10 = int_to_ptr.hbm [resolvable:$true] %s437_s10 }
  0x33   : > { %612 = vmatmul.msk.f32.vlgmr.msra.gmra.mxu0 %vm323_vm0, %v320_v1  ;;  %s805_s18 = sshra.s32 %s438_s10, 4  ;;  %s811_s13 = scalar_lea.hbm %s1120_s4, 16  ;;  %s806_s18 = int_to_ptr.hbm [resolvable:$true] %s805_s18 }
  0x34   : > { %s807_s12 = scalar_lea.hbm %s806_s18, 8  ;;  %p812_p7 = scmp.lt.s32.totalorder %s806_s18, %s1120_s4 }
  0x35   : > { %p808_p4 = scmp.ne.s32.totalorder %s806_s18, %s807_s12  ;;  %p813_p8 = scmp.lt.s32.totalorder %s811_s13, %s807_s12 }
  0x37   : > { %p809_p5 = pnand %p808_p4, %p991_p9  ;;  %p814_p10 = por %p813_p8, %p812_p7 }
  0x39   : > { %p810_p6 = pneg %p809_p5 }
  0x3b   : > { %p815_p13 = pnand %p814_p10, %p810_p6 }
  0xb0   : > { %v347_v2 = vpop.f32.mrf.mxu0 }
  0xb1   : > { %v351_v3 = vsel %vm350_vm1, %v347_v2, -inf }
  0xb2   : > { %352 = vmax.xlane.f32.xlu0 %v351_v3 }
 0x125   : > { %v353_v4 = vpop.xlane.xlu0 %352 }
 0x126   : > { %v354_v5 = vsub.f32 %v347_v2, %v353_v4 }
 0x128   : > { %v355_v6 = vmul.f32 1.442695, %v354_v5 }
 0x12a   : > { %697 = vpow2.f32 %v355_v6 }
 0x130   : > { %v698_v7 = vpop.eup %697 }
 0x131   : > { %v357_v8 = vsel %vm350_vm1, %v698_v7, 0.0 }
 0x132   : > { %358 = vadd.xlane.f32.xlu0 %v357_v8 }
 0x1a5   : > { %v359_v10 = vpop.xlane.xlu0 %358 }
 0x1a6   : > { %699 = vrcp.f32 %v359_v10  ;;  %v371_v14 = vand.u32 2147483648, %v359_v10  ;;  %v369_v16 = vand.u32 2147483647, %v359_v10  ;;  %vm365_vm3 = vweird.f32 %v359_v10 }
 0x1a8   : > { %v372_v18 = vor.u32 1.1754944e-38, %v371_v14  ;;  %vm370_vm5 = vcmp.eq.f32.partialorder %v369_v16, 8.507059e+37 }
 0x1ac   : > { %v700_v11 = vpop.eup %699 }
 0x1ad   : > { %v361_v12 = vmul.f32 %v700_v11, %v359_v10  ;;  %vm366_vm2 = vweird.f32 %v700_v11 }
 0x1ae   : > { %vm367_vm4 = vmor %vm365_vm3, %vm366_vm2 }
 0x1af   : > { %v362_v13 = vsub.f32 1.0, %v361_v12 }
 0x1b1   : > { %v363_v15 = vmul.f32 %v700_v11, %v362_v13 }
 0x1b3   : > { %v364_v17 = vadd.f32 %v700_v11, %v363_v15 }
 0x1b5   : > { %v368_v19 = vsel %vm367_vm4, %v700_v11, %v364_v17 }
 0x1b6   : > { %v373_v20 = vsel %vm370_vm5, %v372_v18, %v368_v19 }
 0x1b7   : > { %v375_v21 = vmul.f32 %v698_v7, %v373_v20 }
 0x1b9   : > { %613 = vmatmul.msk.f32.vlgmr.msra.gmra.mxu1 %vm350_vm1, %v375_v21  ;;  %399 = vst.msk [vmem:[%s319_s25] sm:$0xff] %vm350_vm1, %v375_v21 }
 0x1ba   : > { %818 = shalt.err (!%p815_p13)
}
 0x1bb   : > { %627 = dma.vmem_to_hbm [thread:$0]  (%p991_p9), %s436_s26, 128, %s438_s10, %s407_s11  }
 0x1bc   : > { %s418_s19 = scalar_lea.hbm %s1119_s3, %s616_s27  ;;  %s312_s29 = scalar_lea.vmem [#allocation8], %s1040_s1 }
 0x1bd   : > { %s420_s21 = sshll.u32 %s312_s29, 4  ;;  %s422_s6 = sshll.u32 %s418_s19, 4  ;;  %s421_s21 = int_to_ptr.vmem [resolvable:$true] %s420_s21  ;;  %s423_s6 = int_to_ptr.hbm [resolvable:$true] %s422_s6 }
 0x1be   : > { %s402_s8 = scalar_lea.sflag [#allocation4], %s1037_s23  ;;  %s833_s24 = sshra.s32 %s423_s6, 4  ;;  %s834_s24 = int_to_ptr.hbm [resolvable:$true] %s833_s24 }
 0x1bf   : > { %s835_s25 = scalar_lea.hbm %s834_s24, 8  ;;  %s839_s27 = scalar_lea.hbm %s1119_s3, 16 }
 0x1c0   : > { %p836_p0 = scmp.ne.s32.totalorder %s834_s24, %s835_s25  ;;  %p840_p3 = scmp.lt.s32.totalorder %s834_s24, %s1119_s3 }
 0x1c1   : > { %p841_p4 = scmp.lt.s32.totalorder %s839_s27, %s835_s25 }
 0x1c2   : > { %p837_p1 = pnand %p836_p0, %p991_p9 }
 0x1c3   : > { %p842_p5 = por %p841_p4, %p840_p3 }
 0x1c4   : > { %p838_p2 = pneg %p837_p1 }
 0x1c6   : > { %p843_p6 = pnand %p842_p5, %p838_p2 }
 0x236   : > { %v396_v22 = vpop.f32.mrf.mxu1 }
 0x237   : > { %400 = vst.msk [vmem:[%s312_s29] sm:$0xff] %vm323_vm0, %v396_v22 }
 0x238   : > { %846 = shalt.err (!%p843_p6)
}
 0x239   : > { %626 = dma.vmem_to_hbm [thread:$0]  (%p991_p9), %s421_s21, 128, %s423_s6, %s402_s8  }
 0x23a PF: > { %s449_s23 = sand.u32 1, %s889_s15   ;;  %p641_p7 = pnand %p598_p12, %p998_p11 }
 0x23b   : > { %s450_s18 = scalar_lea.sflag [#allocation4], %s449_s23 }
 0x23c   : > { %p642_p8 = pneg %p641_p7 }
 0x23e   : > { %880 = dma.done.wait (%p642_p8), %s450_s18, 128  }
 0x23f   : > { %882 = vsyncadd (%p642_p8), %s450_s18, 4294967168  ;;  %s460_s12 = scalar_lea.sflag [#allocation10], %s449_s23 }
 0x240   : > { %884 = dma.done.wait (%p642_p8), %s460_s12, 128  }
 0x241   : > { %886 = vsyncadd (%p642_p8), %s460_s12, 4294967168  ;;  %s27_s20 = sadd.s32 1, %s909_s20   ;;  %s1136_s28 = sld [smem:[#allocation15_spill]] }
 0x242   : > { %p24_p10 = scmp.ge.s32.totalorder %s27_s20, 4   ;;  %s1137_s17 = sld [smem:[#allocation18_spill]] }
 0x243   : > { %s1138_s18 = sld [smem:[#allocation16_spill]]  ;;  %s1140_s15 = smov %s893_s16 }
 0x244   : > { %s1139_s19 = sld [smem:[#allocation17_spill]]  ;;  %26 = sbr.rel (!%p24_p10) target bundleno = 12 (0xc), region = 118 }
 0x247   : > { %s1141_s16 = smov %s1136_s28 }
 0x249   :  { %466 = vsyncpa [#allocation3], 1 }
 0x24a   :  { %468 = vsyncpa [#allocation3 + $0x1], 1 }
 0x24b   :  { %469 = vsyncpa [#allocation6], 1 }
 0x24c   :  { %471 = vsyncpa [#allocation6 + $0x1], 1 }
 0x24d   :  { %472 = vsyncpa [#allocation4], 1 }
 0x24e   :  { %474 = vsyncpa [#allocation4 + $0x1], 1 }
 0x24f   :  { %475 = vsyncpa [#allocation10], 1 }
 0x250   :  { %477 = vsyncpa [#allocation10 + $0x1], 1 }

</bundles_post_ra>
